<compile_context>
chip_gen: v5e
topology: v5e:2x2
jax: 0.10.0
libtpu: 0.0.40
codegen_flags: <defaults>
</compile_context>

<pallas_src>
import math
import random as pyrandom

import jax
import jax.numpy as jnp
from jax.experimental import pallas as pl
from jax.experimental.pallas import tpu as pltpu

_TWO_PI = 2.0 * math.pi


def _make_add_gaussian_noise_kernel(mean: float, std: float, tm: int, cols: int):
    mean = float(mean)
    std = float(std)
    half = tm // 2  # each Box-Muller pair fills two half-tiles (cos half / sin half)

    def _mix32(v):
        # lowbias32: high-quality 32-bit avalanche mixer (counter-based PRNG).
        v = (v ^ (v >> 16)) * jnp.uint32(0x7FEB352D)
        v = (v ^ (v >> 15)) * jnp.uint32(0x846CA68B)
        v = v ^ (v >> 16)
        return v

    def kernel(seed_ref, x_ref, o_ref):
        # Global half-row counter for this block; each counter yields TWO normals.
        row = jax.lax.broadcasted_iota(jnp.int32, (half, cols), 0)
        col = jax.lax.broadcasted_iota(jnp.int32, (half, cols), 1)
        base = pl.program_id(0) * half  # per-block offset -> independent noise per block
        ctr_i = (row + base) * cols + col + seed_ref[0]
        ctr = jax.lax.bitcast_convert_type(ctr_i, jnp.uint32)

        b1 = _mix32(ctr)
        b2 = _mix32(ctr ^ jnp.uint32(0x9E3779B9))  # second, decorrelated stream

        # uint32 bits -> uniform f32 in [1, 2) via mantissa stuffing, then shift.
        f1 = jax.lax.bitcast_convert_type((b1 >> 9) | jnp.uint32(0x3F800000), jnp.float32)
        f2 = jax.lax.bitcast_convert_type((b2 >> 9) | jnp.uint32(0x3F800000), jnp.float32)
        u1 = 2.0 - f1  # in (0, 1]  (avoids log(0))
        u2 = f2 - 1.0  # in [0, 1)

        # Box-Muller transform; use BOTH outputs (cos and sin halves).
        r = jnp.sqrt(-2.0 * jnp.log(u1))
        theta = _TWO_PI * u2
        z0 = r * jnp.cos(theta)
        z1 = r * jnp.sin(theta)
        noise = jnp.concatenate([z0, z1], axis=0)  # (tm, cols), standard normal

        x = x_ref[...].astype(jnp.float32)
        o_ref[...] = (x + noise * std + mean).astype(o_ref.dtype)

    return kernel


def _plan(total: int):
    """Pick a lane-dense (rows, cols) layout and a block row count."""
    cols = 128
    for c in (4096, 2048, 1024, 512, 256, 128):
        if total % c == 0 and total // c >= 16:
            cols = c
            break
    rows = pl.cdiv(total, cols)
    # Block rows: multiple of 16 (sublane-aligned halves), block <= ~2 MiB of f32
    # so double-buffered input+output stays well inside scoped VMEM on v5e/v6e/v7x.
    tm = min(rows, max(16, (512 * 1024) // cols))
    tm = max(16, (tm // 16) * 16)
    rows_pad = pl.cdiv(rows, tm) * tm
    return cols, rows_pad, tm


def add_gaussian_noise(x, seed, mean=0.0, std=1.0, p=None):
    """Pallas equivalent of AddGaussianNoise.forward.

    x    : array of any shape (e.g. NCHW)
    seed : python int seeding the counter-based in-kernel PRNG
    """
    # Host-side probabilistic skip, same semantics as the PyTorch module.
    if p and p < pyrandom.random():
        return x

    orig_shape = x.shape
    total = x.size
    cols, rows_pad, tm = _plan(total)
    padded_total = rows_pad * cols

    flat = x.reshape(-1)
    if padded_total != total:
        flat = jnp.pad(flat, (0, padded_total - total))
    x2d = flat.reshape(rows_pad, cols)

    seed_arr = jnp.asarray([seed], dtype=jnp.int32)
    kernel = _make_add_gaussian_noise_kernel(mean, std, tm, cols)

    # TODO(synk): when x is donated in a pipeline, add input_output_aliases={1: 0}
    # to reuse x's HBM buffer (skipped here because the demo reads x afterwards).
    out2d = pl.pallas_call(
        kernel,
        out_shape=jax.ShapeDtypeStruct((rows_pad, cols), x.dtype),
        grid_spec=pltpu.PrefetchScalarGridSpec(
            num_scalar_prefetch=1,
            grid=(rows_pad // tm,),
            in_specs=[pl.BlockSpec((tm, cols), lambda i, seed_ref: (i, 0))],
            out_specs=pl.BlockSpec((tm, cols), lambda i, seed_ref: (i, 0)),
        ),
        compiler_params=pltpu.CompilerParams(
            dimension_semantics=("parallel",),
        ),
    )(seed_arr, x2d)

    out = out2d.reshape(-1)
    if padded_total != total:
        out = out[:total]
    return out.reshape(orig_shape)


if __name__ == "__main__":
    key = jax.random.PRNGKey(0)
    # Small NCHW input consistent with typical conv-style usage.
    x = jax.random.normal(key, (2, 4, 16, 16), dtype=jnp.float32)

    mean, std = 0.5, 2.0
    y = add_gaussian_noise(x, seed=1234, mean=mean, std=std, p=None)
    y = jax.block_until_ready(y)

    # Light sanity checks: shape/dtype preserved, noise actually added.
    assert y.shape == x.shape and y.dtype == x.dtype
    diff = y - x  # should be ~ N(mean, std^2)
    assert jnp.isfinite(diff).all()
    assert abs(float(diff.mean()) - mean) < 0.5
    assert abs(float(diff.std()) - std) < 0.7

    print("KERNEL_OK")
</pallas_src>

<mosaic_0001>
module attributes {stable_mosaic.version = 11 : i64} {
  func.func @kernel(%arg0: i32, %arg1: memref<1xi32, #tpu.memory_space<smem>>, %arg2: memref<16x128xf32, #tpu.memory_space<vmem>>, %arg3: memref<16x128xf32, #tpu.memory_space<vmem>>) attributes {dimension_semantics = [#tpu.dimension_semantics<parallel>], iteration_bounds = array<i64: 1>, scalar_prefetch = 1 : i64, scratch_operands = 0 : i64, tpu.core_type = #tpu.core_type<tc>, window_params = [{transform_indices = @transform_0, window_bounds = array<i64: 16, 128>}, {transform_indices = @transform_1, window_bounds = array<i64: 16, 128>}]} {
    %0 = tpu.iota {dimensions = array<i32: 0>} : vector<8x128xi32>
    %1 = tpu.iota {dimensions = array<i32: 1>} : vector<8x128xi32>
    %c8_i32 = arith.constant 8 : i32
    %2 = arith.muli %arg0, %c8_i32 : i32
    %3 = vector.broadcast %2 : i32 to vector<8x128xi32>
    %4 = arith.addi %0, %3 : vector<8x128xi32>
    %c128_i32 = arith.constant 128 : i32
    %5 = vector.broadcast %c128_i32 : i32 to vector<8x128xi32>
    %6 = arith.muli %4, %5 : vector<8x128xi32>
    %7 = arith.addi %6, %1 : vector<8x128xi32>
    %c0 = arith.constant 0 : index
    %8 = memref.load %arg1[%c0] : memref<1xi32, #tpu.memory_space<smem>>
    %9 = vector.broadcast %8 : i32 to vector<8x128xi32>
    %10 = arith.addi %7, %9 : vector<8x128xi32>
    %11 = tpu.bitcast %10 : vector<8x128xi32> -> vector<8x128xi32>
    %c16_i32 = arith.constant 16 : i32
    %12 = vector.broadcast %c16_i32 : i32 to vector<8x128xi32>
    %13 = arith.shrui %11, %12 : vector<8x128xi32>
    %14 = arith.xori %11, %13 : vector<8x128xi32>
    %c2146121005_i32 = arith.constant 2146121005 : i32
    %15 = vector.broadcast %c2146121005_i32 : i32 to vector<8x128xi32>
    %16 = arith.muli %14, %15 : vector<8x128xi32>
    %c15_i32 = arith.constant 15 : i32
    %17 = vector.broadcast %c15_i32 : i32 to vector<8x128xi32>
    %18 = arith.shrui %16, %17 : vector<8x128xi32>
    %19 = arith.xori %16, %18 : vector<8x128xi32>
    %c-2073254261_i32 = arith.constant -2073254261 : i32
    %20 = vector.broadcast %c-2073254261_i32 : i32 to vector<8x128xi32>
    %21 = arith.muli %19, %20 : vector<8x128xi32>
    %c16_i32_0 = arith.constant 16 : i32
    %22 = vector.broadcast %c16_i32_0 : i32 to vector<8x128xi32>
    %23 = arith.shrui %21, %22 : vector<8x128xi32>
    %24 = arith.xori %21, %23 : vector<8x128xi32>
    %c-1640531527_i32 = arith.constant -1640531527 : i32
    %25 = vector.broadcast %c-1640531527_i32 : i32 to vector<8x128xi32>
    %26 = arith.xori %11, %25 : vector<8x128xi32>
    %c16_i32_1 = arith.constant 16 : i32
    %27 = vector.broadcast %c16_i32_1 : i32 to vector<8x128xi32>
    %28 = arith.shrui %26, %27 : vector<8x128xi32>
    %29 = arith.xori %26, %28 : vector<8x128xi32>
    %c2146121005_i32_2 = arith.constant 2146121005 : i32
    %30 = vector.broadcast %c2146121005_i32_2 : i32 to vector<8x128xi32>
    %31 = arith.muli %29, %30 : vector<8x128xi32>
    %c15_i32_3 = arith.constant 15 : i32
    %32 = vector.broadcast %c15_i32_3 : i32 to vector<8x128xi32>
    %33 = arith.shrui %31, %32 : vector<8x128xi32>
    %34 = arith.xori %31, %33 : vector<8x128xi32>
    %c-2073254261_i32_4 = arith.constant -2073254261 : i32
    %35 = vector.broadcast %c-2073254261_i32_4 : i32 to vector<8x128xi32>
    %36 = arith.muli %34, %35 : vector<8x128xi32>
    %c16_i32_5 = arith.constant 16 : i32
    %37 = vector.broadcast %c16_i32_5 : i32 to vector<8x128xi32>
    %38 = arith.shrui %36, %37 : vector<8x128xi32>
    %39 = arith.xori %36, %38 : vector<8x128xi32>
    %c9_i32 = arith.constant 9 : i32
    %40 = vector.broadcast %c9_i32 : i32 to vector<8x128xi32>
    %41 = arith.shrui %24, %40 : vector<8x128xi32>
    %c1065353216_i32 = arith.constant 1065353216 : i32
    %42 = vector.broadcast %c1065353216_i32 : i32 to vector<8x128xi32>
    %43 = arith.ori %41, %42 : vector<8x128xi32>
    %44 = tpu.bitcast %43 : vector<8x128xi32> -> vector<8x128xf32>
    %c9_i32_6 = arith.constant 9 : i32
    %45 = vector.broadcast %c9_i32_6 : i32 to vector<8x128xi32>
    %46 = arith.shrui %39, %45 : vector<8x128xi32>
    %c1065353216_i32_7 = arith.constant 1065353216 : i32
    %47 = vector.broadcast %c1065353216_i32_7 : i32 to vector<8x128xi32>
    %48 = arith.ori %46, %47 : vector<8x128xi32>
    %49 = tpu.bitcast %48 : vector<8x128xi32> -> vector<8x128xf32>
    %cst = arith.constant 2.000000e+00 : f32
    %50 = vector.broadcast %cst : f32 to vector<8x128xf32>
    %51 = arith.subf %50, %44 : vector<8x128xf32>
    %cst_8 = arith.constant 1.000000e+00 : f32
    %52 = vector.broadcast %cst_8 : f32 to vector<8x128xf32>
    %53 = arith.subf %49, %52 : vector<8x128xf32>
    %54 = math.log %51 : vector<8x128xf32>
    %cst_9 = arith.constant -2.000000e+00 : f32
    %55 = vector.broadcast %cst_9 : f32 to vector<8x128xf32>
    %56 = arith.mulf %55, %54 : vector<8x128xf32>
    %57 = math.sqrt %56 : vector<8x128xf32>
    %cst_10 = arith.constant 6.28318548 : f32
    %58 = vector.broadcast %cst_10 : f32 to vector<8x128xf32>
    %59 = arith.mulf %58, %53 : vector<8x128xf32>
    %60 = math.cos %59 : vector<8x128xf32>
    %61 = arith.mulf %57, %60 : vector<8x128xf32>
    %62 = math.sin %59 : vector<8x128xf32>
    %63 = arith.mulf %57, %62 : vector<8x128xf32>
    %64 = tpu.concatenate %61, %63 in 0 : vector<8x128xf32>, vector<8x128xf32> -> vector<16x128xf32>
    %c0_11 = arith.constant 0 : index
    %c0_12 = arith.constant 0 : index
    %65 = vector.load %arg2[%c0_11, %c0_12] : memref<16x128xf32, #tpu.memory_space<vmem>>, vector<16x128xf32>
    %cst_13 = arith.constant 2.000000e+00 : f32
    %66 = vector.broadcast %cst_13 : f32 to vector<16x128xf32>
    %67 = arith.mulf %64, %66 : vector<16x128xf32>
    %68 = arith.addf %65, %67 : vector<16x128xf32>
    %cst_14 = arith.constant 5.000000e-01 : f32
    %69 = vector.broadcast %cst_14 : f32 to vector<16x128xf32>
    %70 = arith.addf %68, %69 : vector<16x128xf32>
    %c0_15 = arith.constant 0 : index
    %c0_16 = arith.constant 0 : index
    %71 = vector.load %arg3[%c0_15, %c0_16] : memref<16x128xf32, #tpu.memory_space<vmem>>, vector<16x128xf32>
    tpu.vector_store %arg3[%c0_15, %c0_16], %70 {strides = array<i32>} : memref<16x128xf32, #tpu.memory_space<vmem>>, vector<16x128xf32>,
    return
  }
  func.func @transform_0(%arg0: i32, %arg1: memref<1xi32, #tpu.memory_space<smem>>) -> (i32, i32) {
    %c0_i32 = arith.constant 0 : i32
    %c0_i32_0 = arith.constant 0 : i32
    return %arg0, %c0_i32 : i32, i32
  }
  func.func @transform_1(%arg0: i32, %arg1: memref<1xi32, #tpu.memory_space<smem>>) -> (i32, i32) {
    %c0_i32 = arith.constant 0 : i32
    %c0_i32_0 = arith.constant 0 : i32
    return %arg0, %c0_i32 : i32, i32
  }
}

</mosaic_0001>

<bundles_post_ra>
// kernel: tpu_custom_call.1
= control target key start
LH: loop header
LB: loop body
LE: loop exit
PB: predicated region body
PF: predicated region fallthrough
CT: control target
= control target key end

     0   :  { %8 = vsyncpa [#allocation5], 0  ;;  %s590_s0 = inlined_call_operand.<no memory space> [shape: s32[1], index: 0, kind: input, shape index: {}]   ;;  %s591_s1 = inlined_call_operand.hbm [shape: f32[16,128], index: 1, kind: input, shape index: {}]   ;;  %s592_s2 = inlined_call_operand.hbm [shape: f32[16,128], index: 2, kind: output, shape index: {}]  }
   0x1   :  { %9 = vsyncpa [#allocation6], 0  ;;  %s14_s11 = sshll.u32 %s591_s1, 4  ;;  %s494_s12 = smov [#allocation4]   ;;  %s15_s11 = int_to_ptr.hbm [resolvable:$true] %s14_s11 }
   0x2   :  { %s16_s13 = sshll.u32 %s494_s12, 4  ;;  %s495_s14 = smov 128   ;;  %s17_s13 = int_to_ptr.vmem [resolvable:$true] %s16_s13 }
   0x3   :  { %s496_s15 = smov 8  }
   0x4   :  { %22 = dma.hbm_to_vmem [thread:$0]  %s15_s11, 256, %s17_s13, [#allocation5], %s495_s14, %s495_s14, %s496_s15  }
   0x5   :  { %490 = dma.done.wait [#allocation5], 256  }
   0x6   :  { %491 = vsyncadd [#allocation5], 4294967040  ;;  %v27_v0 = vlaneseq  ;;  %v37_v4 = vstv %s590_s0  ;;  %v497_v36 = vmov 683565275   ;;  %v498_v38 = vmov 2475754826  }
   0x7   :  { %v499_v40 = vmov 2131351028   ;;  %v500_v42 = vmov 2102212464   ;;  %v501_v44 = vmov 920167782  }
   0x8   :  { %v28_v1 = vshrl.u32 %v27_v0, 7  ;;  %v30_v2 = vand.u32 127, %v27_v0  ;;  %v502_v51 = vmov 1326507024   ;;  %s504_s0 = smov [#allocation7]   ;;  %s407_s20 = sshll.u32 %s592_s2, 4  ;;  %s408_s20 = int_to_ptr.hbm [resolvable:$true] %s407_s20 }
   0x9   :  { %s405_s1 = sshll.u32 %s504_s0, 4  ;;  %s406_s1 = int_to_ptr.vmem [resolvable:$true] %s405_s1 }
   0xa   :  { %v34_v3 = vmul.u32 128, %v28_v1 }
   0xc   :  { %v35_v5 = vadd.s32 %v34_v3, %v30_v2 }
   0xe   :  { %v38_v6 = vadd.s32 %v37_v4, %v35_v5 }
  0x10   :  { %v47_v7 = vxor.u32 2654435769, %v38_v6  ;;  %v39_v17 = vshrl.u32 %v38_v6, 16 }
  0x12   :  { %v48_v8 = vshrl.u32 %v47_v7, 16  ;;  %v40_v20 = vxor.u32 %v39_v17, %v38_v6 }
  0x14   :  { %v49_v9 = vxor.u32 %v48_v8, %v47_v7  ;;  %v41_v23 = vmul.u32 2146121005, %v40_v20 }
  0x16   :  { %v50_v10 = vmul.u32 2146121005, %v49_v9  ;;  %v42_v27 = vshrl.u32 %v41_v23, 15 }
  0x18   :  { %v51_v11 = vshrl.u32 %v50_v10, 15  ;;  %v43_v31 = vxor.u32 %v42_v27, %v41_v23 }
  0x1a   :  { %v52_v12 = vxor.u32 %v51_v11, %v50_v10  ;;  %v44_v46 = vmul.u32 2221713035, %v43_v31 }
  0x1c   :  { %v53_v13 = vmul.u32 2221713035, %v52_v12  ;;  %v45_v60 = vshrl.u32 %v44_v46, 16 }
  0x1e   :  { %v54_v14 = vshrl.u32 %v53_v13, 16  ;;  %v46_v9 = vxor.u32 %v45_v60, %v44_v46 }
  0x20   :  { %v55_v15 = vxor.u32 %v54_v14, %v53_v13 }
  0x22   :  { %v59_v16 = vshrl.u32 %v55_v15, 9 }
  0x24   :  { %v60_v18 = vor.u32 1065353216, %v59_v16 }
  0x26   :  { %v420_v19 = vadd.f32 -1.0, %v60_v18 }
  0x28   :  { %v529_v21 = vmul.f32 6.2831855, %v420_v19 }
  0x2a   :  { %v83_v22 = vand.u32 2139095040, %v529_v21  ;;  %v80_v25 = vand.u32 2147483647, %v529_v21  ;;  %vm82_vm12 = vcmp.lt.s32.totalorder %v529_v21, 0 }
  0x2c   :  { %v84_v24 = vshrl.u32 %v83_v22, 23  ;;  %v87_v29 = vand.u32 8388607, %v80_v25  ;;  %v56_v22 = vshrl.u32 %v46_v9, 9  ;;  %vm81_vm13 = vcmp.le.f32.partialorder %v80_v25, 0.7853982 }
  0x2e   :  { %v421_v26 = vadd.s32 4294967169, %v84_v24  ;;  %v88_v34 = vor.u32 8388608, %v87_v29  ;;  %v57_v46 = vor.u32 1065353216, %v56_v22 }
  0x30   :  { %v90_v28 = vadd.s32 1, %v421_v26  ;;  %v539_v55 = vshll.u32 %v88_v34, 8 }
  0x32   :  { %vm91_vm0 = vcmp.gt.s32.totalorder %v90_v28, 0  ;;  %v129_v2 = vand.u32 65535, %v539_v55  ;;  %v130_v3 = vshrl.u32 %v539_v55, 16 }
  0x33   :  { %v92_v30 = vsel %vm91_vm0, %v90_v28, 0 }
  0x34   :  { %v94_v32 = vand.u32 31, %v92_v30  ;;  %v535_v33 = vshrl.u32 %v92_v30, 5  ;;  %v503_v30 = vmov 0  }
  0x36   :  { %v95_v35 = vsub.s32 32, %v94_v32  ;;  %v97_v37 = vshll.u32 %v497_v36, %v94_v32  ;;  %v100_v39 = vshll.u32 %v498_v38, %v94_v32  ;;  %v103_v41 = vshll.u32 %v499_v40, %v94_v32 }
  0x37   :  { %v106_v43 = vshll.u32 %v500_v42, %v94_v32  ;;  %v109_v45 = vshll.u32 %v501_v44, %v94_v32  ;;  %vm112_vm1 = vcmp.lt.s32.totalorder %v535_v33, 1  ;;  %vm115_vm2 = vcmp.lt.s32.totalorder %v535_v33, 4 }
  0x38   :  { %v98_v47 = vshrl.u32 %v498_v38, %v95_v35  ;;  %v101_v48 = vshrl.u32 %v499_v40, %v95_v35  ;;  %v104_v49 = vshrl.u32 %v500_v42, %v95_v35  ;;  %v107_v50 = vshrl.u32 %v501_v44, %v95_v35 }
  0x39   :  { %v110_v52 = vshrl.u32 %v502_v51, %v95_v35  ;;  %vm114_vm3 = vcmp.lt.s32.totalorder %v535_v33, 3  ;;  %vm113_vm4 = vcmp.lt.s32.totalorder %v535_v33, 2  ;;  %v96_v11 = vshrl.u32 %v497_v36, %v95_v35 }
  0x3a   :  { %v99_v53 = vor.u32 %v98_v47, %v97_v37  ;;  %v102_v54 = vor.u32 %v101_v48, %v100_v39  ;;  %v105_v56 = vor.u32 %v104_v49, %v103_v41  ;;  %v108_v57 = vor.u32 %v107_v50, %v106_v43 }
  0x3b   :  { %v111_v58 = vor.u32 %v110_v52, %v109_v45 }
  0x3c   :  { %v120_v59 = vsel %vm112_vm1, %v99_v53, %v102_v54  ;;  %v121_v61 = vsel %vm115_vm2, %v108_v57, 920167782  ;;  %v124_v62 = vsel %vm112_vm1, %v102_v54, %v105_v56  ;;  %v116_v26 = vsel %vm112_vm1, %v96_v11, %v99_v53 }
  0x3d   :  { %v125_v63 = vsel %vm115_vm2, %v111_v58, 1326507024  ;;  %v122_v0 = vsel %vm114_vm3, %v105_v56, %v121_v61  ;;  %v117_v29 = vsel %vm115_vm2, %v105_v56, 2102212464  ;;  %v62_v53 = vsub.f32 2.0, %v57_v46 }
  0x3e   :  { %v126_v1 = vsel %vm114_vm3, %v108_v57, %v125_v63  ;;  %v123_v4 = vsel %vm113_vm4, %v120_v59, %v122_v0  ;;  %v118_v40 = vsel %vm114_vm3, %v102_v54, %v117_v29 }
  0x3f   :  { %v127_v5 = vsel %vm113_vm4, %v124_v62, %v126_v1  ;;  %v153_v8 = vand.u32 65535, %v123_v4  ;;  %v154_v10 = vshrl.u32 %v123_v4, 16  ;;  %v119_v49 = vsel %vm113_vm4, %v116_v26, %v118_v40 }
  0x40   :  { %v131_v6 = vand.u32 65535, %v127_v5  ;;  %v132_v7 = vshrl.u32 %v127_v5, 16  ;;  %v173_v56 = vmul.u32 %v539_v55, %v119_v49  ;;  %438 = vlog2.f32 %v62_v53 }
  0x41   :  { %v155_v15 = vmul.u32 %v153_v8, %v129_v2  ;;  %v156_v16 = vmul.u32 %v154_v10, %v129_v2  ;;  %v157_v17 = vmul.u32 %v153_v8, %v130_v3  ;;  %v158_v23 = vmul.u32 %v154_v10, %v130_v3 }
  0x42   :  { %v133_v12 = vmul.u32 %v131_v6, %v129_v2  ;;  %v134_v13 = vmul.u32 %v132_v7, %v129_v2  ;;  %v135_v14 = vmul.u32 %v131_v6, %v130_v3  ;;  %v136_v18 = vmul.u32 %v132_v7, %v130_v3 }
  0x43   :  { %v159_v24 = vshll.u32 %v156_v16, 16  ;;  %v161_v28 = vshll.u32 %v157_v17, 16  ;;  %v160_v38 = vshrl.u32 %v156_v16, 16  ;;  %v162_v44 = vshrl.u32 %v157_v17, 16 }
  0x44   :  { %v137_v19 = vshll.u32 %v134_v13, 16  ;;  %v139_v20 = vshll.u32 %v135_v14, 16  ;;  %v138_v34 = vshrl.u32 %v134_v13, 16  ;;  %v140_v41 = vshrl.u32 %v135_v14, 16 }
  0x45   :  { %vm163_vm6 = vc.u32 %v155_v15, %v159_v24  ;;  %v165_v32 = vadd.s32 %v159_v24, %v155_v15 }
  0x46   :  { %vm141_vm5 = vc.u32 %v133_v12, %v137_v19  ;;  %v143_v27 = vadd.s32 %v137_v19, %v133_v12  ;;  %v164_v36 = vsel %vm163_vm6, 1, %v503_v30  ;;  %v439_v61 = vpop.eup %438  ;;  %vm223_vm6 = vweird.f32 %v529_v21 }
  0x47   :  { %v142_v31 = vsel %vm141_vm5, 1, %v503_v30  ;;  %v166_v39 = vadd.s32 %v164_v36, %v158_v23  ;;  %vm167_vm8 = vc.u32 %v165_v32, %v161_v28  ;;  %v169_v48 = vadd.s32 %v165_v32, %v161_v28 }
  0x48   :  { %v144_v35 = vadd.s32 %v142_v31, %v136_v18  ;;  %vm145_vm7 = vc.u32 %v143_v27, %v139_v20  ;;  %v168_v43 = vsel %vm167_vm8, 1, %v503_v30  ;;  %v65_v0 = vmul.f32 0.6931472, %v439_v61 }
  0x49   :  { %v146_v37 = vsel %vm145_vm7, 1, %v503_v30  ;;  %v170_v45 = vadd.s32 %v168_v43, %v166_v39 }
  0x4a   :  { %v148_v42 = vadd.s32 %v146_v37, %v144_v35  ;;  %v570_v2 = vmul.f32 -2.0, %v65_v0 }
  0x4b   :  { %v171_v50 = vadd.s32 %v170_v45, %v160_v38 }
  0x4c   :  { %v149_v47 = vadd.s32 %v148_v42, %v138_v34  ;;  %440 = vrsqrt.f32 %v570_v2  ;;  %vm74_vm14 = vcmp.eq.f32.partialorder %v570_v2, inf  ;;  %vm76_vm1 = vcmp.eq.f32.partialorder %v570_v2, 0.0 }
  0x4d   :  { %v172_v52 = vadd.s32 %v171_v50, %v162_v44 }
  0x4e   :  { %v150_v51 = vadd.s32 %v149_v47, %v140_v41 }
  0x4f   :  { %v176_v57 = vadd.s32 1, %v172_v52 }
  0x50   :  { %vm175_vm9 = vc.u32 %v150_v51, %v169_v48  ;;  %v174_v55 = vadd.s32 %v169_v48, %v150_v51  ;;  %v77_v48 = vand.u32 2147483648, %v570_v2 }
  0x51   :  { %v177_v54 = vsel %vm175_vm9, %v176_v57, %v172_v52 }
  0x52   :  { %v178_v58 = vadd.s32 %v177_v54, %v173_v56  ;;  %v441_v11 = vpop.eup %440 }
  0x53   :  { %v68_v16 = vmul.f32 %v441_v11, %v570_v2 }
  0x54   :  { %v179_v59 = vadd.s32 536870912, %v178_v58 }
  0x55   :  { %v69_v19 = vmul.f32 %v441_v11, %v68_v16 }
  0x56   :  { %v180_v60 = vshrl.u32 %v179_v59, 30 }
  0x57   :  { %v70_v24 = vmul.f32 0.5, %v69_v19 }
  0x58   :  { %v181_v62 = vshll.u32 %v180_v60, 30  ;;  %v204_v20 = vsub.s32 4, %v180_v60 }
  0x59   :  { %v71_v32 = vsub.f32 1.5, %v70_v24 }
  0x5a   :  { %v182_v63 = vsub.s32 %v178_v58, %v181_v62  ;;  %v205_v26 = vsel %vm82_vm12, %v204_v20, %v180_v60 }
  0x5b   :  { %v207_v29 = vsel %vm81_vm13, 0, %v205_v26  ;;  %v72_v39 = vmul.f32 %v441_v11, %v71_v32 }
  0x5c   :  { %vm183_vm10 = vcmp.lt.s32.totalorder %v182_v63, 0  ;;  %v184_v33 = vsub.s32 0, %v182_v63  ;;  %v379_v36 = vadd.s32 3, %v207_v29  ;;  %v224_v25 = vand.u32 3, %v207_v29 }
  0x5d   :  { %v73_v45 = vmul.f32 %v72_v39, %v570_v2 }
  0x5e   :  { %v185_v1 = vsel %vm183_vm10, %v184_v33, %v182_v63  ;;  %v380_v42 = vand.u32 3, %v379_v36  ;;  %vm229_vm15 = vcmp.eq.s32.totalorder %v224_v25, 2  ;;  %vm225_vm2 = vcmp.lt.s32.totalorder %v224_v25, 2  ;;  %v391_v33 = vld [vmem:[#allocation4] sm:$0xff] }
  0x5f   :  { %v186_v3 = vclz %v185_v1  ;;  %v75_v51 = vsel %vm74_vm14, %v570_v2, %v73_v45  ;;  %vm226_vm3 = vcmp.eq.s32.totalorder %v224_v25, 0  ;;  %v392_v1 = vld [vmem:[#allocation4 + $0x8] sm:$0xff] }
  0x60   :  { %vm385_vm0 = vcmp.eq.s32.totalorder %v380_v42, 2  ;;  %vm382_vm4 = vcmp.eq.s32.totalorder %v380_v42, 0  ;;  %vm381_vm5 = vcmp.lt.s32.totalorder %v380_v42, 2  ;;  %v78_v57 = vsel %vm76_vm1, %v77_v48, %v75_v51 }
  0x61   :  { %v422_v4 = vadd.s32 4294967294, %v186_v3 }
  0x63   :  { %vm423_vm11 = vcmp.lt.s32.totalorder %v422_v4, 0 }
  0x64   :  { %v189_v5 = vsel %vm423_vm11, 0, %v422_v4 }
  0x65   :  { %v190_v6 = vsub.s32 32, %v189_v5  ;;  %v191_v7 = vshll.u32 %v182_v63, %v189_v5  ;;  %v194_v8 = vsub.s32 4294967266, %v189_v5 }
  0x67   :  { %v192_v9 = vshrl.u32 %v174_v55, %v190_v6  ;;  %v195_v10 = vadd.s32 127, %v194_v8 }
  0x69   :  { %v193_v12 = vor.u32 %v192_v9, %v191_v7  ;;  %v196_v13 = vshll.u32 %v195_v10, 23 }
  0x6b   :  { %v197_v14 = vor.u32 4788187, %v196_v13  ;;  %v200_v15 = vcvt.s32.f32 %v193_v12 }
  0x6d   :  { %v198_v17 = vand.u32 2147483647, %v197_v14 }
  0x6f   :  { %v201_v18 = vmul.f32 %v200_v15, %v198_v17 }
  0x71   :  { %v202_v22 = vxor.u32 2147483648, %v201_v18 }
  0x73   :  { %v203_v23 = vsel %vm82_vm12, %v202_v22, %v201_v18 }
  0x74   :  { %v206_v27 = vsel %vm81_vm13, %v529_v21, %v203_v23 }
  0x75   :  { %v208_v28 = vmul.f32 %v206_v27, %v206_v27 }
  0x77   :  { %v209_v30 = vmul.f32 -0.001358992, %v208_v28  ;;  %v216_v31 = vmul.f32 -0.00019511016, %v208_v28 }
  0x79   :  { %v210_v34 = vadd.f32 0.041655596, %v209_v30  ;;  %v217_v35 = vadd.f32 0.008332121, %v216_v31 }
  0x7b   :  { %v211_v37 = vmul.f32 %v210_v34, %v208_v28  ;;  %v218_v38 = vmul.f32 %v217_v35, %v208_v28 }
  0x7d   :  { %v212_v40 = vadd.f32 -0.4999988, %v211_v37  ;;  %v219_v41 = vadd.f32 -0.16666654, %v218_v38 }
  0x7f   :  { %v213_v43 = vmul.f32 %v212_v40, %v208_v28  ;;  %v220_v44 = vmul.f32 %v219_v41, %v208_v28 }
  0x81   :  { %v214_v46 = vadd.f32 1.0, %v213_v43  ;;  %v221_v47 = vadd.f32 1.0, %v220_v44 }
  0x83   :  { %v222_v49 = vmul.f32 %v221_v47, %v206_v27  ;;  %v230_v50 = vxor.u32 2147483648, %v214_v46 }
  0x85   :  { %v227_v52 = vxor.u32 2147483648, %v222_v49  ;;  %v231_v53 = vsel %vm229_vm15, %v230_v50, %v222_v49  ;;  %v387_v56 = vsel %vm385_vm0, %v230_v50, %v222_v49 }
  0x87   :  { %v228_v54 = vsel %vm226_vm3, %v214_v46, %v227_v52  ;;  %v384_v58 = vsel %vm382_vm4, %v214_v46, %v227_v52 }
  0x88   :  { %v232_v59 = vsel %vm225_vm2, %v228_v54, %v231_v53  ;;  %v388_v60 = vsel %vm381_vm5, %v384_v58, %v387_v56 }
  0x89   :  { %v233_v61 = vsel %vm223_vm6, nan, %v232_v59  ;;  %v389_v62 = vsel %vm223_vm6, nan, %v388_v60 }
  0x8a   :  { %v234_v63 = vmul.f32 %v233_v61, %v78_v57  ;;  %v390_v0 = vmul.f32 %v389_v62, %v78_v57 }
  0x8c   :  { %v393_v2 = vmul.f32 2.0, %v234_v63  ;;  %v394_v3 = vmul.f32 2.0, %v390_v0 }
  0x8e   :  { %v395_v4 = vadd.f32 %v393_v2, %v391_v33  ;;  %v396_v55 = vadd.f32 %v394_v3, %v392_v1 }
  0x90   :  { %v397_v21 = vadd.f32 0.5, %v395_v4  ;;  %v398_v5 = vadd.f32 0.5, %v396_v55 }
  0x92   :  { %399 = vst [vmem:[#allocation7] sm:$0xff] %v397_v21 }
  0x93   :  { %400 = vst [vmem:[#allocation7 + $0x8] sm:$0xff] %v398_v5 }
  0x94   :  { %413 = dma.vmem_to_hbm [thread:$0]  %s406_s1, 256, %s408_s20, [#allocation6], %s495_s14, %s495_s14, %s496_s15  }
  0x95   :  { %492 = dma.done.wait [#allocation6], 256  }
  0x96   :  { %493 = vsyncadd [#allocation6], 4294967040 }
  0x97   :  { %418 = vsyncpa [#allocation5], 1 }
  0x98   :  { %419 = vsyncpa [#allocation6], 1 }

</bundles_post_ra>
